<compile_context>
chip_gen: v5e
topology: v5e:2x2
jax: 0.10.0
libtpu: 0.0.40
codegen_flags: <defaults>
</compile_context>

<pallas_src>
import functools

import jax
import jax.numpy as jnp
from jax.experimental import pallas as pl
from jax.experimental.pallas import tpu as pltpu


def _mha_kernel(x_ref, wqkv_ref, bqkv_ref, wo_ref, bo_ref,
                out_ref, attn_ref,
                q_sc, k_sc, v_sc, ctx_sc, *, num_heads):
    """Fused multi-head attention for one batch element.

    x_ref    : (S, E)      bf16
    wqkv_ref : (E, 3E)     bf16  fused [wq*scale | wk | wv], (in, out) layout
    bqkv_ref : (1, 3E)     f32   fused [bq*scale | bk | bv]
    wo_ref   : (E, E)      bf16
    bo_ref   : (1, E)      f32
    out_ref  : (S, E)      f32
    attn_ref : (H, S, S)   f32   (already the torch (B, H, S, S) layout)
    q_sc/k_sc/v_sc : VMEM (H, S, hd) bf16 head-major staging
    ctx_sc   : VMEM (S, E) bf16 lane-dense context for the output projection
    """
    S, E = x_ref.shape
    hd = E // num_heads

    # Fused Q|K|V projection: one lane-dense bf16 MXU matmul with f32
    # accumulation and a single hoisted bias add (scale pre-folded into Q).
    qkv = jnp.dot(x_ref[...], wqkv_ref[...],
                  preferred_element_type=jnp.float32) + bqkv_ref[0]    # (S, 3E)

    # Head-major staging via scratch stores (Mosaic-safe "transpose"): after
    # this, every attention matmul is batched over all heads at once.
    for h in range(num_heads):
        lo = h * hd
        q_sc[h] = qkv[:, lo:lo + hd].astype(jnp.bfloat16)
        k_sc[h] = qkv[:, E + lo:E + lo + hd].astype(jnp.bfloat16)
        v_sc[h] = qkv[:, 2 * E + lo:2 * E + lo + hd].astype(jnp.bfloat16)

    # Scores for all heads in one batched MXU sequence (bf16 in, f32 out).
    scores = jnp.einsum("hqd,hkd->hqk", q_sc[...], k_sc[...],
                        preferred_element_type=jnp.float32)            # (H,S,S)

    # Numerically-stable softmax; reciprocal goes to the (otherwise idle) EUP.
    m = jnp.max(scores, axis=-1, keepdims=True)
    e = jnp.exp(scores - m)
    aw = e * pl.reciprocal(jnp.sum(e, axis=-1, keepdims=True), approx=True)

    # One whole-block store, already in the torch (B, H, S, S) layout.
    attn_ref[...] = aw
    # TODO(synk): at production S make this output optional / lane-dense and go
    # flash-style with a q-tile grid axis (it dominates HBM bytes and VMEM).

    # Context for all heads, batched.
    ctx = jnp.einsum("hqk,hkd->hqd", aw.astype(jnp.bfloat16), v_sc[...],
                     preferred_element_type=jnp.float32)               # (H,S,hd)

    # Re-interleave heads into lanes, then ONE full-K (K = E) output projection
    # instead of H rank-hd matmuls.
    for h in range(num_heads):
        ctx_sc[:, h * hd:(h + 1) * hd] = ctx[h].astype(jnp.bfloat16)

    out = jnp.dot(ctx_sc[...], wo_ref[...],
                  preferred_element_type=jnp.float32) + bo_ref[0]
    out_ref[...] = out.astype(out_ref.dtype)


def _vmem_limit_bytes(S, E, H):
    """Explicit scoped-VMEM budget from the actual block sizes (+ headroom)."""
    bf16, f32 = 2, 4
    hd = E // H
    x_blk = S * E * bf16
    out_blk = S * E * f32
    attn_blk = H * S * S * f32
    w_bytes = (E * 3 * E) * bf16 + (3 * E) * f32 + (E * E) * bf16 + E * f32
    scratch = 3 * H * S * hd * bf16 + S * E * bf16
    need = 2 * (x_blk + out_blk + attn_blk) + 2 * w_bytes + scratch
    # Floor at 16 MiB, cap at v7x's 64 MiB physical VMEM.
    return int(min(64 << 20, max(need + (8 << 20), 16 << 20)))


def multi_head_attention(x, params, *, num_heads):
    """x: (B, S, E) f32.  params: dict of wq/bq/wk/bk/wv/bv/wo/bo (f32).

    Returns (out (B,S,E) f32, attention_weights (B,H,S,S) f32) — same semantics
    as the PyTorch module's forward.  MXU operands run in bf16 (f32 accum).
    """
    B, S, E = x.shape
    assert E % num_heads == 0
    hd = E // num_heads
    scale = 1.0 / float(hd) ** 0.5

    # Weight-side prep (cheap, outside the kernel): fold the 1/sqrt(hd) scale
    # into the Q projection, fuse Q|K|V, cast MXU operands to bf16.
    wqkv = jnp.concatenate(
        [params["wq"] * scale, params["wk"], params["wv"]], axis=1
    ).astype(jnp.bfloat16)                                             # (E, 3E)
    bqkv = jnp.concatenate(
        [params["bq"] * scale, params["bk"], params["bv"]]
    ).reshape(1, 3 * E).astype(jnp.float32)
    wo = params["wo"].astype(jnp.bfloat16)
    bo = params["bo"].reshape(1, E).astype(jnp.float32)
    x_bf = x.astype(jnp.bfloat16)

    kernel = functools.partial(_mha_kernel, num_heads=num_heads)

    out, attn = pl.pallas_call(
        kernel,
        out_shape=(
            jax.ShapeDtypeStruct((B, S, E), jnp.float32),
            jax.ShapeDtypeStruct((B, num_heads, S, S), jnp.float32),
        ),
        grid_spec=pltpu.PrefetchScalarGridSpec(
            num_scalar_prefetch=0,
            # One batch element per step: >=2 steps for B>=2 so input/output
            # DMAs pipeline and both v7x TensorCores get work.
            grid=(B,),
            in_specs=[
                pl.BlockSpec((None, S, E), lambda b: (b, 0, 0)),       # x
                pl.BlockSpec((E, 3 * E), lambda b: (0, 0)),            # wqkv
                pl.BlockSpec((1, 3 * E), lambda b: (0, 0)),            # bqkv
                pl.BlockSpec((E, E), lambda b: (0, 0)),                # wo
                pl.BlockSpec((1, E), lambda b: (0, 0)),                # bo
            ],
            out_specs=[
                pl.BlockSpec((None, S, E), lambda b: (b, 0, 0)),
                pl.BlockSpec((None, num_heads, S, S), lambda b: (b, 0, 0, 0)),
            ],
            scratch_shapes=[
                pltpu.VMEM((num_heads, S, hd), jnp.bfloat16),   # q head-major
                pltpu.VMEM((num_heads, S, hd), jnp.bfloat16),   # k head-major
                pltpu.VMEM((num_heads, S, hd), jnp.bfloat16),   # v head-major
                pltpu.VMEM((S, E), jnp.bfloat16),               # ctx lane-dense
            ],
        ),
        compiler_params=pltpu.CompilerParams(
            dimension_semantics=("parallel",),
            vmem_limit_bytes=_vmem_limit_bytes(S, E, num_heads),
        ),
    )(x_bf, wqkv, bqkv, wo, bo)

    return out, attn


def _reference(x, params, *, num_heads):
    """Pure-JAX f32 reference mirroring the PyTorch forward exactly."""
    B, S, E = x.shape
    hd = E // num_heads
    q = x @ params["wq"] + params["bq"]
    k = x @ params["wk"] + params["bk"]
    v = x @ params["wv"] + params["bv"]

    def split(t):  # (B,S,E) -> (B,H,S,hd)
        return t.reshape(B, S, num_heads, hd).transpose(0, 2, 1, 3)

    q, k, v = split(q), split(k), split(v)
    scores = jnp.einsum("bhqd,bhkd->bhqk", q, k) / jnp.sqrt(jnp.float32(hd))
    aw = jax.nn.softmax(scores, axis=-1)
    ctx = jnp.einsum("bhqk,bhkd->bhqd", aw, v)
    ctx = ctx.transpose(0, 2, 1, 3).reshape(B, S, E)
    return ctx @ params["wo"] + params["bo"], aw


if __name__ == "__main__":
    B, S, E, H = 2, 8, 32, 4

    key = jax.random.PRNGKey(0)
    keys = jax.random.split(key, 9)

    bound = 1.0 / jnp.sqrt(jnp.float32(E))

    def init_w(k):
        return jax.random.uniform(k, (E, E), jnp.float32, -bound, bound)

    def init_b(k):
        return jax.random.uniform(k, (E,), jnp.float32, -bound, bound)

    params = {
        "wq": init_w(keys[0]), "bq": init_b(keys[1]),
        "wk": init_w(keys[2]), "bk": init_b(keys[3]),
        "wv": init_w(keys[4]), "bv": init_b(keys[5]),
        "wo": init_w(keys[6]), "bo": init_b(keys[7]),
    }
    x = jax.random.normal(keys[8], (B, S, E), jnp.float32)

    out, attn = multi_head_attention(x, params, num_heads=H)
    out = jax.block_until_ready(out)
    attn = jax.block_until_ready(attn)

    ref_out, ref_attn = _reference(x, params, num_heads=H)
    assert out.shape == (B, S, E) and attn.shape == (B, H, S, S)
    # bf16 MXU operands + approx reciprocal => relaxed tolerances (explicit
    # accuracy decision per the performance review).
    assert jnp.allclose(out, ref_out, atol=3e-2, rtol=3e-2)
    assert jnp.allclose(attn, ref_attn, atol=3e-2, rtol=3e-2)

    print("KERNEL_OK")
</pallas_src>

<mosaic_0001>
module attributes {stable_mosaic.version = 11 : i64} {
  func.func @_mha_kernel(%arg0: i32, %arg1: memref<1x8x32xbf16, #tpu.memory_space<vmem>>, %arg2: memref<32x96xbf16, #tpu.memory_space<vmem>>, %arg3: memref<1x96xf32, #tpu.memory_space<vmem>>, %arg4: memref<32x32xbf16, #tpu.memory_space<vmem>>, %arg5: memref<1x32xf32, #tpu.memory_space<vmem>>, %arg6: memref<1x8x32xf32, #tpu.memory_space<vmem>>, %arg7: memref<1x4x8x8xf32, #tpu.memory_space<vmem>>, %arg8: memref<4x8x8xbf16, #tpu.memory_space<vmem>>, %arg9: memref<4x8x8xbf16, #tpu.memory_space<vmem>>, %arg10: memref<4x8x8xbf16, #tpu.memory_space<vmem>>, %arg11: memref<8x32xbf16, #tpu.memory_space<vmem>>) attributes {dimension_semantics = [#tpu.dimension_semantics<parallel>], iteration_bounds = array<i64: 2>, scalar_prefetch = 0 : i64, scratch_operands = 4 : i64, tpu.core_type = #tpu.core_type<tc>, window_params = [{transform_indices = @transform_0, window_bounds = array<i64: 1, 8, 32>}, {pipeline_mode = #tpu.pipeline_mode<synchronous>, transform_indices = @transform_1, window_bounds = array<i64: 32, 96>}, {pipeline_mode = #tpu.pipeline_mode<synchronous>, transform_indices = @transform_2, window_bounds = array<i64: 1, 96>}, {pipeline_mode = #tpu.pipeline_mode<synchronous>, transform_indices = @transform_3, window_bounds = array<i64: 32, 32>}, {pipeline_mode = #tpu.pipeline_mode<synchronous>, transform_indices = @transform_4, window_bounds = array<i64: 1, 32>}, {transform_indices = @transform_5, window_bounds = array<i64: 1, 8, 32>}, {transform_indices = @transform_6, window_bounds = array<i64: 1, 4, 8, 8>}]} {
    %c0 = arith.constant 0 : index
    %c0_0 = arith.constant 0 : index
    %c0_1 = arith.constant 0 : index
    %0 = vector.load %arg1[%c0, %c0_0, %c0_1] : memref<1x8x32xbf16, #tpu.memory_space<vmem>>, vector<1x8x32xbf16>
    %1 = vector.shape_cast %0 : vector<1x8x32xbf16> to vector<8x32xbf16>
    %c0_2 = arith.constant 0 : index
    %c0_3 = arith.constant 0 : index
    %2 = vector.load %arg2[%c0_2, %c0_3] : memref<32x96xbf16, #tpu.memory_space<vmem>>, vector<32x96xbf16>
    %cst = arith.constant dense<0.000000e+00> : vector<8x96xf32>
    %3 = tpu.matmul %1, %2, %cst {dimension_numbers = #tpu.dot_dimension_numbers<[1], [0], [0], [1], [0, 0, 1, 1], [], []>} : vector<8x32xbf16>, vector<32x96xbf16>, vector<8x96xf32> -> vector<8x96xf32>
    %c0_4 = arith.constant 0 : index
    %c0_5 = arith.constant 0 : index
    %4 = vector.load %arg3[%c0_4, %c0_5] : memref<1x96xf32, #tpu.memory_space<vmem>>, vector<1x96xf32>
    %5 = vector.shape_cast %4 : vector<1x96xf32> to vector<96xf32>
    %6 = vector.shape_cast %5 : vector<96xf32> to vector<1x96xf32>
    %7 = vector.broadcast %6 : vector<1x96xf32> to vector<8x96xf32>
    %8 = arith.addf %3, %7 : vector<8x96xf32>
    %9 = vector.extract_strided_slice %8 {offsets = [0, 0], sizes = [8, 8], strides = [1, 1]} : vector<8x96xf32> to vector<8x8xf32>
    %10 = arith.truncf %9 : vector<8x8xf32> to vector<8x8xbf16>
    %c0_6 = arith.constant 0 : index
    %c0_7 = arith.constant 0 : index
    %c0_8 = arith.constant 0 : index
    %11 = vector.load %arg8[%c0_6, %c0_7, %c0_8] : memref<4x8x8xbf16, #tpu.memory_space<vmem>>, vector<1x8x8xbf16>
    %12 = vector.shape_cast %11 : vector<1x8x8xbf16> to vector<8x8xbf16>
    %13 = vector.shape_cast %10 : vector<8x8xbf16> to vector<1x8x8xbf16>
    tpu.vector_store %arg8[%c0_6, %c0_7, %c0_8], %13 {strides = array<i32>} : memref<4x8x8xbf16, #tpu.memory_space<vmem>>, vector<1x8x8xbf16>,
    %14 = vector.extract_strided_slice %8 {offsets = [0, 32], sizes = [8, 8], strides = [1, 1]} : vector<8x96xf32> to vector<8x8xf32>
    %15 = arith.truncf %14 : vector<8x8xf32> to vector<8x8xbf16>
    %c0_9 = arith.constant 0 : index
    %c0_10 = arith.constant 0 : index
    %c0_11 = arith.constant 0 : index
    %16 = vector.load %arg9[%c0_9, %c0_10, %c0_11] : memref<4x8x8xbf16, #tpu.memory_space<vmem>>, vector<1x8x8xbf16>
    %17 = vector.shape_cast %16 : vector<1x8x8xbf16> to vector<8x8xbf16>
    %18 = vector.shape_cast %15 : vector<8x8xbf16> to vector<1x8x8xbf16>
    tpu.vector_store %arg9[%c0_9, %c0_10, %c0_11], %18 {strides = array<i32>} : memref<4x8x8xbf16, #tpu.memory_space<vmem>>, vector<1x8x8xbf16>,
    %19 = vector.extract_strided_slice %8 {offsets = [0, 64], sizes = [8, 8], strides = [1, 1]} : vector<8x96xf32> to vector<8x8xf32>
    %20 = arith.truncf %19 : vector<8x8xf32> to vector<8x8xbf16>
    %c0_12 = arith.constant 0 : index
    %c0_13 = arith.constant 0 : index
    %c0_14 = arith.constant 0 : index
    %21 = vector.load %arg10[%c0_12, %c0_13, %c0_14] : memref<4x8x8xbf16, #tpu.memory_space<vmem>>, vector<1x8x8xbf16>
    %22 = vector.shape_cast %21 : vector<1x8x8xbf16> to vector<8x8xbf16>
    %23 = vector.shape_cast %20 : vector<8x8xbf16> to vector<1x8x8xbf16>
    tpu.vector_store %arg10[%c0_12, %c0_13, %c0_14], %23 {strides = array<i32>} : memref<4x8x8xbf16, #tpu.memory_space<vmem>>, vector<1x8x8xbf16>,
    %24 = vector.extract_strided_slice %8 {offsets = [0, 8], sizes = [8, 8], strides = [1, 1]} : vector<8x96xf32> to vector<8x8xf32>
    %25 = arith.truncf %24 : vector<8x8xf32> to vector<8x8xbf16>
    %c1 = arith.constant 1 : index
    %c0_15 = arith.constant 0 : index
    %c0_16 = arith.constant 0 : index
    %26 = vector.load %arg8[%c1, %c0_15, %c0_16] : memref<4x8x8xbf16, #tpu.memory_space<vmem>>, vector<1x8x8xbf16>
    %27 = vector.shape_cast %26 : vector<1x8x8xbf16> to vector<8x8xbf16>
    %28 = vector.shape_cast %25 : vector<8x8xbf16> to vector<1x8x8xbf16>
    tpu.vector_store %arg8[%c1, %c0_15, %c0_16], %28 {strides = array<i32>} : memref<4x8x8xbf16, #tpu.memory_space<vmem>>, vector<1x8x8xbf16>,
    %29 = vector.extract_strided_slice %8 {offsets = [0, 40], sizes = [8, 8], strides = [1, 1]} : vector<8x96xf32> to vector<8x8xf32>
    %30 = arith.truncf %29 : vector<8x8xf32> to vector<8x8xbf16>
    %c1_17 = arith.constant 1 : index
    %c0_18 = arith.constant 0 : index
    %c0_19 = arith.constant 0 : index
    %31 = vector.load %arg9[%c1_17, %c0_18, %c0_19] : memref<4x8x8xbf16, #tpu.memory_space<vmem>>, vector<1x8x8xbf16>
    %32 = vector.shape_cast %31 : vector<1x8x8xbf16> to vector<8x8xbf16>
    %33 = vector.shape_cast %30 : vector<8x8xbf16> to vector<1x8x8xbf16>
    tpu.vector_store %arg9[%c1_17, %c0_18, %c0_19], %33 {strides = array<i32>} : memref<4x8x8xbf16, #tpu.memory_space<vmem>>, vector<1x8x8xbf16>,
    %34 = vector.extract_strided_slice %8 {offsets = [0, 72], sizes = [8, 8], strides = [1, 1]} : vector<8x96xf32> to vector<8x8xf32>
    %35 = arith.truncf %34 : vector<8x8xf32> to vector<8x8xbf16>
    %c1_20 = arith.constant 1 : index
    %c0_21 = arith.constant 0 : index
    %c0_22 = arith.constant 0 : index
    %36 = vector.load %arg10[%c1_20, %c0_21, %c0_22] : memref<4x8x8xbf16, #tpu.memory_space<vmem>>, vector<1x8x8xbf16>
    %37 = vector.shape_cast %36 : vector<1x8x8xbf16> to vector<8x8xbf16>
    %38 = vector.shape_cast %35 : vector<8x8xbf16> to vector<1x8x8xbf16>
    tpu.vector_store %arg10[%c1_20, %c0_21, %c0_22], %38 {strides = array<i32>} : memref<4x8x8xbf16, #tpu.memory_space<vmem>>, vector<1x8x8xbf16>,
    %39 = vector.extract_strided_slice %8 {offsets = [0, 16], sizes = [8, 8], strides = [1, 1]} : vector<8x96xf32> to vector<8x8xf32>
    %40 = arith.truncf %39 : vector<8x8xf32> to vector<8x8xbf16>
    %c2 = arith.constant 2 : index
    %c0_23 = arith.constant 0 : index
    %c0_24 = arith.constant 0 : index
    %41 = vector.load %arg8[%c2, %c0_23, %c0_24] : memref<4x8x8xbf16, #tpu.memory_space<vmem>>, vector<1x8x8xbf16>
    %42 = vector.shape_cast %41 : vector<1x8x8xbf16> to vector<8x8xbf16>
    %43 = vector.shape_cast %40 : vector<8x8xbf16> to vector<1x8x8xbf16>
    tpu.vector_store %arg8[%c2, %c0_23, %c0_24], %43 {strides = array<i32>} : memref<4x8x8xbf16, #tpu.memory_space<vmem>>, vector<1x8x8xbf16>,
    %44 = vector.extract_strided_slice %8 {offsets = [0, 48], sizes = [8, 8], strides = [1, 1]} : vector<8x96xf32> to vector<8x8xf32>
    %45 = arith.truncf %44 : vector<8x8xf32> to vector<8x8xbf16>
    %c2_25 = arith.constant 2 : index
    %c0_26 = arith.constant 0 : index
    %c0_27 = arith.constant 0 : index
    %46 = vector.load %arg9[%c2_25, %c0_26, %c0_27] : memref<4x8x8xbf16, #tpu.memory_space<vmem>>, vector<1x8x8xbf16>
    %47 = vector.shape_cast %46 : vector<1x8x8xbf16> to vector<8x8xbf16>
    %48 = vector.shape_cast %45 : vector<8x8xbf16> to vector<1x8x8xbf16>
    tpu.vector_store %arg9[%c2_25, %c0_26, %c0_27], %48 {strides = array<i32>} : memref<4x8x8xbf16, #tpu.memory_space<vmem>>, vector<1x8x8xbf16>,
    %49 = vector.extract_strided_slice %8 {offsets = [0, 80], sizes = [8, 8], strides = [1, 1]} : vector<8x96xf32> to vector<8x8xf32>
    %50 = arith.truncf %49 : vector<8x8xf32> to vector<8x8xbf16>
    %c2_28 = arith.constant 2 : index
    %c0_29 = arith.constant 0 : index
    %c0_30 = arith.constant 0 : index
    %51 = vector.load %arg10[%c2_28, %c0_29, %c0_30] : memref<4x8x8xbf16, #tpu.memory_space<vmem>>, vector<1x8x8xbf16>
    %52 = vector.shape_cast %51 : vector<1x8x8xbf16> to vector<8x8xbf16>
    %53 = vector.shape_cast %50 : vector<8x8xbf16> to vector<1x8x8xbf16>
    tpu.vector_store %arg10[%c2_28, %c0_29, %c0_30], %53 {strides = array<i32>} : memref<4x8x8xbf16, #tpu.memory_space<vmem>>, vector<1x8x8xbf16>,
    %54 = vector.extract_strided_slice %8 {offsets = [0, 24], sizes = [8, 8], strides = [1, 1]} : vector<8x96xf32> to vector<8x8xf32>
    %55 = arith.truncf %54 : vector<8x8xf32> to vector<8x8xbf16>
    %c3 = arith.constant 3 : index
    %c0_31 = arith.constant 0 : index
    %c0_32 = arith.constant 0 : index
    %56 = vector.load %arg8[%c3, %c0_31, %c0_32] : memref<4x8x8xbf16, #tpu.memory_space<vmem>>, vector<1x8x8xbf16>
    %57 = vector.shape_cast %56 : vector<1x8x8xbf16> to vector<8x8xbf16>
    %58 = vector.shape_cast %55 : vector<8x8xbf16> to vector<1x8x8xbf16>
    tpu.vector_store %arg8[%c3, %c0_31, %c0_32], %58 {strides = array<i32>} : memref<4x8x8xbf16, #tpu.memory_space<vmem>>, vector<1x8x8xbf16>,
    %59 = vector.extract_strided_slice %8 {offsets = [0, 56], sizes = [8, 8], strides = [1, 1]} : vector<8x96xf32> to vector<8x8xf32>
    %60 = arith.truncf %59 : vector<8x8xf32> to vector<8x8xbf16>
    %c3_33 = arith.constant 3 : index
    %c0_34 = arith.constant 0 : index
    %c0_35 = arith.constant 0 : index
    %61 = vector.load %arg9[%c3_33, %c0_34, %c0_35] : memref<4x8x8xbf16, #tpu.memory_space<vmem>>, vector<1x8x8xbf16>
    %62 = vector.shape_cast %61 : vector<1x8x8xbf16> to vector<8x8xbf16>
    %63 = vector.shape_cast %60 : vector<8x8xbf16> to vector<1x8x8xbf16>
    tpu.vector_store %arg9[%c3_33, %c0_34, %c0_35], %63 {strides = array<i32>} : memref<4x8x8xbf16, #tpu.memory_space<vmem>>, vector<1x8x8xbf16>,
    %64 = vector.extract_strided_slice %8 {offsets = [0, 88], sizes = [8, 8], strides = [1, 1]} : vector<8x96xf32> to vector<8x8xf32>
    %65 = arith.truncf %64 : vector<8x8xf32> to vector<8x8xbf16>
    %c3_36 = arith.constant 3 : index
    %c0_37 = arith.constant 0 : index
    %c0_38 = arith.constant 0 : index
    %66 = vector.load %arg10[%c3_36, %c0_37, %c0_38] : memref<4x8x8xbf16, #tpu.memory_space<vmem>>, vector<1x8x8xbf16>
    %67 = vector.shape_cast %66 : vector<1x8x8xbf16> to vector<8x8xbf16>
    %68 = vector.shape_cast %65 : vector<8x8xbf16> to vector<1x8x8xbf16>
    tpu.vector_store %arg10[%c3_36, %c0_37, %c0_38], %68 {strides = array<i32>} : memref<4x8x8xbf16, #tpu.memory_space<vmem>>, vector<1x8x8xbf16>,
    %c0_39 = arith.constant 0 : index
    %c0_40 = arith.constant 0 : index
    %c0_41 = arith.constant 0 : index
    %69 = vector.load %arg8[%c0_39, %c0_40, %c0_41] : memref<4x8x8xbf16, #tpu.memory_space<vmem>>, vector<4x8x8xbf16>
    %c0_42 = arith.constant 0 : index
    %c0_43 = arith.constant 0 : index
    %c0_44 = arith.constant 0 : index
    %70 = vector.load %arg9[%c0_42, %c0_43, %c0_44] : memref<4x8x8xbf16, #tpu.memory_space<vmem>>, vector<4x8x8xbf16>
    "tpu.trace_start"() <{level = 10 : i32, message = "hqd,hkd->hqk"}> : () -> ()
    %cst_45 = arith.constant dense<0.000000e+00> : vector<4x8x8xf32>
    %71 = tpu.matmul %69, %70, %cst_45 {dimension_numbers = #tpu.dot_dimension_numbers<[2], [2], [1], [1], [0, 0, 0, 1, 1, 1], [0], [0]>} : vector<4x8x8xbf16>, vector<4x8x8xbf16>, vector<4x8x8xf32> -> vector<4x8x8xf32>
    "tpu.trace_stop"() : () -> ()
    %cst_46 = arith.constant dense<0xFF800000> : vector<4x8xf32>
    %72 = vector.multi_reduction <maximumf>, %71, %cst_46 [2] : vector<4x8x8xf32> to vector<4x8xf32>
    %73 = vector.shape_cast %72 : vector<4x8xf32> to vector<4x8x1xf32>
    %74 = vector.broadcast %73 : vector<4x8x1xf32> to vector<4x8x8xf32>
    %75 = arith.subf %71, %74 : vector<4x8x8xf32>
    %76 = math.exp %75 : vector<4x8x8xf32>
    %cst_47 = arith.constant dense<0.000000e+00> : vector<4x8xf32>
    %77 = vector.multi_reduction <add>, %76, %cst_47 [2] : vector<4x8x8xf32> to vector<4x8xf32>
    %78 = vector.shape_cast %77 : vector<4x8xf32> to vector<4x8x1xf32>
    %79 = tpu.reciprocal %78 {approx = true} : vector<4x8x1xf32> -> vector<4x8x1xf32>
    %80 = vector.broadcast %79 : vector<4x8x1xf32> to vector<4x8x8xf32>
    %81 = arith.mulf %76, %80 : vector<4x8x8xf32>
    %c0_48 = arith.constant 0 : index
    %c0_49 = arith.constant 0 : index
    %c0_50 = arith.constant 0 : index
    %c0_51 = arith.constant 0 : index
    %82 = vector.load %arg7[%c0_48, %c0_49, %c0_50, %c0_51] : memref<1x4x8x8xf32, #tpu.memory_space<vmem>>, vector<1x4x8x8xf32>
    %83 = vector.shape_cast %82 : vector<1x4x8x8xf32> to vector<4x8x8xf32>
    %84 = vector.shape_cast %81 : vector<4x8x8xf32> to vector<1x4x8x8xf32>
    tpu.vector_store %arg7[%c0_48, %c0_49, %c0_50, %c0_51], %84 {strides = array<i32>} : memref<1x4x8x8xf32, #tpu.memory_space<vmem>>, vector<1x4x8x8xf32>,
    %85 = arith.truncf %81 : vector<4x8x8xf32> to vector<4x8x8xbf16>
    %c0_52 = arith.constant 0 : index
    %c0_53 = arith.constant 0 : index
    %c0_54 = arith.constant 0 : index
    %86 = vector.load %arg10[%c0_52, %c0_53, %c0_54] : memref<4x8x8xbf16, #tpu.memory_space<vmem>>, vector<4x8x8xbf16>
    "tpu.trace_start"() <{level = 10 : i32, message = "hqk,hkd->hqd"}> : () -> ()
    %cst_55 = arith.constant dense<0.000000e+00> : vector<4x8x8xf32>
    %87 = tpu.matmul %85, %86, %cst_55 {dimension_numbers = #tpu.dot_dimension_numbers<[2], [1], [1], [2], [0, 0, 0, 1, 1, 2], [0], [0]>} : vector<4x8x8xbf16>, vector<4x8x8xbf16>, vector<4x8x8xf32> -> vector<4x8x8xf32>
    "tpu.trace_stop"() : () -> ()
    %88 = vector.extract_strided_slice %87 {offsets = [0, 0, 0], sizes = [1, 8, 8], strides = [1, 1, 1]} : vector<4x8x8xf32> to vector<1x8x8xf32>
    %89 = vector.shape_cast %88 : vector<1x8x8xf32> to vector<8x8xf32>
    %90 = arith.truncf %89 : vector<8x8xf32> to vector<8x8xbf16>
    %c0_56 = arith.constant 0 : index
    %c0_57 = arith.constant 0 : index
    %91 = vector.load %arg11[%c0_56, %c0_57] : memref<8x32xbf16, #tpu.memory_space<vmem>>, vector<8x8xbf16>
    tpu.vector_store %arg11[%c0_56, %c0_57], %90 {strides = array<i32>} : memref<8x32xbf16, #tpu.memory_space<vmem>>, vector<8x8xbf16>,
    %92 = vector.extract_strided_slice %87 {offsets = [1, 0, 0], sizes = [1, 8, 8], strides = [1, 1, 1]} : vector<4x8x8xf32> to vector<1x8x8xf32>
    %93 = vector.shape_cast %92 : vector<1x8x8xf32> to vector<8x8xf32>
    %94 = arith.truncf %93 : vector<8x8xf32> to vector<8x8xbf16>
    %c0_58 = arith.constant 0 : index
    %c8 = arith.constant 8 : index
    %95 = vector.load %arg11[%c0_58, %c8] : memref<8x32xbf16, #tpu.memory_space<vmem>>, vector<8x8xbf16>
    tpu.vector_store %arg11[%c0_58, %c8], %94 {strides = array<i32>} : memref<8x32xbf16, #tpu.memory_space<vmem>>, vector<8x8xbf16>,
    %96 = vector.extract_strided_slice %87 {offsets = [2, 0, 0], sizes = [1, 8, 8], strides = [1, 1, 1]} : vector<4x8x8xf32> to vector<1x8x8xf32>
    %97 = vector.shape_cast %96 : vector<1x8x8xf32> to vector<8x8xf32>
    %98 = arith.truncf %97 : vector<8x8xf32> to vector<8x8xbf16>
    %c0_59 = arith.constant 0 : index
    %c16 = arith.constant 16 : index
    %99 = vector.load %arg11[%c0_59, %c16] : memref<8x32xbf16, #tpu.memory_space<vmem>>, vector<8x8xbf16>
    tpu.vector_store %arg11[%c0_59, %c16], %98 {strides = array<i32>} : memref<8x32xbf16, #tpu.memory_space<vmem>>, vector<8x8xbf16>,
    %100 = vector.extract_strided_slice %87 {offsets = [3, 0, 0], sizes = [1, 8, 8], strides = [1, 1, 1]} : vector<4x8x8xf32> to vector<1x8x8xf32>
    %101 = vector.shape_cast %100 : vector<1x8x8xf32> to vector<8x8xf32>
    %102 = arith.truncf %101 : vector<8x8xf32> to vector<8x8xbf16>
    %c0_60 = arith.constant 0 : index
    %c24 = arith.constant 24 : index
    %103 = vector.load %arg11[%c0_60, %c24] : memref<8x32xbf16, #tpu.memory_space<vmem>>, vector<8x8xbf16>
    tpu.vector_store %arg11[%c0_60, %c24], %102 {strides = array<i32>} : memref<8x32xbf16, #tpu.memory_space<vmem>>, vector<8x8xbf16>,
    %c0_61 = arith.constant 0 : index
    %c0_62 = arith.constant 0 : index
    %104 = vector.load %arg11[%c0_61, %c0_62] : memref<8x32xbf16, #tpu.memory_space<vmem>>, vector<8x32xbf16>
    %c0_63 = arith.constant 0 : index
    %c0_64 = arith.constant 0 : index
    %105 = vector.load %arg4[%c0_63, %c0_64] : memref<32x32xbf16, #tpu.memory_space<vmem>>, vector<32x32xbf16>
    %cst_65 = arith.constant dense<0.000000e+00> : vector<8x32xf32>
    %106 = tpu.matmul %104, %105, %cst_65 {dimension_numbers = #tpu.dot_dimension_numbers<[1], [0], [0], [1], [0, 0, 1, 1], [], []>} : vector<8x32xbf16>, vector<32x32xbf16>, vector<8x32xf32> -> vector<8x32xf32>
    %c0_66 = arith.constant 0 : index
    %c0_67 = arith.constant 0 : index
    %107 = vector.load %arg5[%c0_66, %c0_67] : memref<1x32xf32, #tpu.memory_space<vmem>>, vector<1x32xf32>
    %108 = vector.shape_cast %107 : vector<1x32xf32> to vector<32xf32>
    %109 = vector.shape_cast %108 : vector<32xf32> to vector<1x32xf32>
    %110 = vector.broadcast %109 : vector<1x32xf32> to vector<8x32xf32>
    %111 = arith.addf %106, %110 : vector<8x32xf32>
    %c0_68 = arith.constant 0 : index
    %c0_69 = arith.constant 0 : index
    %c0_70 = arith.constant 0 : index
    %112 = vector.load %arg6[%c0_68, %c0_69, %c0_70] : memref<1x8x32xf32, #tpu.memory_space<vmem>>, vector<1x8x32xf32>
    %113 = vector.shape_cast %112 : vector<1x8x32xf32> to vector<8x32xf32>
    %114 = vector.shape_cast %111 : vector<8x32xf32> to vector<1x8x32xf32>
    tpu.vector_store %arg6[%c0_68, %c0_69, %c0_70], %114 {strides = array<i32>} : memref<1x8x32xf32, #tpu.memory_space<vmem>>, vector<1x8x32xf32>,
    return
  }
  func.func @transform_0(%arg0: i32) -> (i32, i32, i32) {
    %c0_i32 = arith.constant 0 : i32
    %c0_i32_0 = arith.constant 0 : i32
    %c0_i32_1 = arith.constant 0 : i32
    return %arg0, %c0_i32, %c0_i32_0 : i32, i32, i32
  }
  func.func @transform_1(%arg0: i32) -> (i32, i32) {
    %c0_i32 = arith.constant 0 : i32
    %c0_i32_0 = arith.constant 0 : i32
    %c0_i32_1 = arith.constant 0 : i32
    return %c0_i32, %c0_i32_0 : i32, i32
  }
  func.func @transform_2(%arg0: i32) -> (i32, i32) {
    %c0_i32 = arith.constant 0 : i32
    %c0_i32_0 = arith.constant 0 : i32
    %c0_i32_1 = arith.constant 0 : i32
    return %c0_i32, %c0_i32_0 : i32, i32
  }
  func.func @transform_3(%arg0: i32) -> (i32, i32) {
    %c0_i32 = arith.constant 0 : i32
    %c0_i32_0 = arith.constant 0 : i32
    %c0_i32_1 = arith.constant 0 : i32
    return %c0_i32, %c0_i32_0 : i32, i32
  }
  func.func @transform_4(%arg0: i32) -> (i32, i32) {
    %c0_i32 = arith.constant 0 : i32
    %c0_i32_0 = arith.constant 0 : i32
    %c0_i32_1 = arith.constant 0 : i32
    return %c0_i32, %c0_i32_0 : i32, i32
  }
  func.func @transform_5(%arg0: i32) -> (i32, i32, i32) {
    %c0_i32 = arith.constant 0 : i32
    %c0_i32_0 = arith.constant 0 : i32
    %c0_i32_1 = arith.constant 0 : i32
    return %arg0, %c0_i32, %c0_i32_0 : i32, i32, i32
  }
  func.func @transform_6(%arg0: i32) -> (i32, i32, i32, i32) {
    %c0_i32 = arith.constant 0 : i32
    %c0_i32_0 = arith.constant 0 : i32
    %c0_i32_1 = arith.constant 0 : i32
    %c0_i32_2 = arith.constant 0 : i32
    return %arg0, %c0_i32, %c0_i32_0, %c0_i32_1 : i32, i32, i32, i32
  }
}

</mosaic_0001>

<bundles_post_ra>
// kernel: tpu_custom_call.1
= control target key start
LH: loop header
LB: loop body
LE: loop exit
PB: predicated region body
PF: predicated region fallthrough
CT: control target
= control target key end

     0   :  { %s1489_s0 = inlined_call_operand.hbm [shape: bf16[2,8,32], index: 0, kind: input, shape index: {}]   ;;  %s1490_s1 = inlined_call_operand.hbm [shape: bf16[32,96], index: 1, kind: input, shape index: {}]   ;;  %s1491_s2 = inlined_call_operand.vmem [shape: f32[1,96], index: 2, kind: input, shape index: {}]   ;;  %s1492_s3 = inlined_call_operand.hbm [shape: bf16[32,32], index: 3, kind: input, shape index: {}]   ;;  %s1493_s4 = inlined_call_operand.vmem [shape: f32[1,32], index: 4, kind: input, shape index: {}]   ;;  %s1494_s5 = inlined_call_operand.hbm [shape: f32[2,8,32], index: 5, kind: output, shape index: {0}]   ;;  %s1495_s6 = inlined_call_operand.hbm [shape: f32[2,4,8,8], index: 6, kind: output, shape index: {1}]  }
   0x1   :  { %1497 = sst [smem:[#allocation19_spill]] %s1490_s1 }
   0x2   :  { %12 = vsyncpa [#allocation7], 0 }
   0x3   :  { %14 = vsyncpa [#allocation7 + $0x1], 0 }
   0x4   :  { %15 = vsyncpa [#allocation10], 0 }
   0x5   :  { %16 = vsyncpa [#allocation8], 0 }
   0x6   :  { %18 = vsyncpa [#allocation8 + $0x1], 0 }
   0x7   :  { %19 = vsyncpa [#allocation14], 0 }
   0x8   :  { %21 = vsyncpa [#allocation14 + $0x1], 0  ;;  %s1254_s21 = smov 0   ;;  %s1256_s22 = smov 0  }
   0x9   :  { %s1258_s23 = smov 0   ;;  %s1260_s24 = smov 0  }
   0xa LB: > { %s1498_s1 = sld [smem:[#allocation19_spill]]  ;;  %s1278_s28 = sadd.s32 4294967295, %s1198_s24   ;;  %s1198_s24 = sphi %s1260_s24, %s1510_s24   ;;  %s1194_s23 = sphi %s1258_s23, %s1509_s23   ;;  %s1190_s22 = sphi %s1256_s22, %s1508_s22   ;;  %s1186_s21 = sphi %s1254_s21, %s1507_s21  }
   0xb   : > { %p849_p0 = scmp.ge.s32.totalorder %s1198_s24, 1  ;;  %p48_p1 = scmp.eq.s32.totalorder %s1278_s28, 0 }
   0xc   : > { %p194_p2 = scmp.lt.s32.totalorder %s1198_s24, 3  ;;  %s1200_s30 = smov [#allocation9]  }
   0xd   : > { %s207_s7 = sshll.u32 %s1200_s30, 4  ;;  %s222_s10 = sshll.u32 %s1492_s3, 4  ;;  %s208_s7 = int_to_ptr.vmem [resolvable:$true] %s207_s7  ;;  %s223_s10 = int_to_ptr.hbm [resolvable:$true] %s222_s10 }
   0xe   : > { %p1283_p3 = pnand %p849_p0, %p194_p2  ;;  %s1201_s11 = smov [#allocation11]  }
   0xf   : > { %s224_s12 = sshll.u32 %s1201_s11, 4  ;;  %s1202_s13 = smov 64   ;;  %s225_s12 = int_to_ptr.vmem [resolvable:$true] %s224_s12 }
  0x10   : > { %s205_s27 = sshll.u32 %s1498_s1, 4  ;;  %p913_p4 = pneg %p1283_p3  ;;  %s206_s27 = int_to_ptr.hbm [resolvable:$true] %s205_s27 }
  0x11   : > { %s1203_s14 = smov 4   ;;  %s848_s15 = sadd.s32 4294967294, %s1198_s24  }
  0x12   : > { %p914_p6 = pnand %p913_p4, %p48_p1  ;;  %s1297_s16 = sadd.s32 1, %s1198_s24  }
  0x13   : > { %s31_s17 = ssub.s32 %s1198_s24, %s1297_s16  ;;  %s34_s18 = sadd.s32 1, %s1194_s23 }
  0x14   : > { %916 = dma.hbm_to_vmem [thread:$0]  (!%p914_p6), %s206_s27, 256, %s208_s7, [#allocation10], %s1202_s13, %s1202_s13, %s1203_s14  }
  0x15   : > { %919 = dma.hbm_to_vmem [thread:$0]  (!%p914_p6), %s223_s10, 256, %s225_s12, [#allocation10], %s1202_s13, %s1202_s13, %s1203_s14  }
  0x16   : > { %p32_p7 = scmp.eq.s32.totalorder %s31_s17, 0  ;;  %p41_p8 = scmp.ne.s32.totalorder %s1194_s23, %s1190_s22 }
  0x17   : > { %p42_p9 = scmp.eq.s32.totalorder %s1198_s24, 0  ;;  %p47_p10 = scmp.ne.s32.totalorder %s1190_s22, %s1186_s21 }
  0x18   : > { %s1308_s19 = scalar_select %p32_p7, %s1194_s23, %s34_s18  }
  0x19   : > { %p1310_p11 = por %p42_p9, %p41_p8  ;;  %p1316_p12 = por %p48_p1, %p47_p10 }
  0x1a   : > { %p155_p13 = scmp.eq.s32.totalorder %s1278_s28, 1  ;;  %p161_p0 = scmp.eq.s32.totalorder %s848_s15, 1 }
  0x1b   : > { %p933_p2 = scmp.lt.s32.totalorder %s1198_s24, 2  ;;  %s241_s26 = sand.u32 1, %s1194_s23  }
  0x1c   : > { %p1323_p4 = por %p155_p13, %p41_p8  ;;  %p1327_p6 = por %p161_p0, %p47_p10 }
  0x1d   : > { %s853_s7 = sshll.u32 %s241_s26, 2  ;;  %s854_s8 = sshll.u32 %s1198_s24, 2 }
  0x1e   : > { %s249_s11 = scalar_lea.hbm %s1489_s0, %s854_s8  ;;  %s245_s12 = scalar_lea.vmem [#allocation6], %s853_s7 }
  0x1f   : > { %s253_s13 = sshll.u32 %s245_s12, 4  ;;  %s251_s14 = sshll.u32 %s249_s11, 4  ;;  %s254_s13 = int_to_ptr.vmem [resolvable:$true] %s253_s13  ;;  %s252_s14 = int_to_ptr.hbm [resolvable:$true] %s251_s14 }
  0x20   : > { %p1337_p7 = pnand %p933_p2, %p1310_p11  ;;  %s242_s17 = scalar_lea.sflag [#allocation7], %s241_s26 }
  0x21   : > { %s1066_s18 = sshra.s32 %s252_s14, 4  ;;  %s1073_s9 = scalar_lea.hbm %s1489_s0, 8  ;;  %s1067_s18 = int_to_ptr.hbm [resolvable:$true] %s1066_s18 }
  0x22   : > { %s1068_s1 = scalar_lea.hbm %s1067_s18, 4  ;;  %p1070_p9 = pneg %p1337_p7 }
  0x23   : > { %p1069_p8 = scmp.ne.s32.totalorder %s1067_s18, %s1068_s1  ;;  %p1074_p11 = scmp.lt.s32.totalorder %s1067_s18, %s1489_s0 }
  0x24   : > { %p1075_p0 = scmp.lt.s32.totalorder %s1073_s9, %s1068_s1 }
  0x25   : > { %p1071_p10 = pnand %p1070_p9, %p1069_p8 }
  0x26   : > { %p1076_p2 = por %p1075_p0, %p1074_p11 }
  0x27   : > { %p1072_p13 = pneg %p1071_p10 }
  0x29   : > { %p1077_p5 = pnand %p1076_p2, %p1072_p13 }
  0x2b   : > { %1080 = shalt.err (!%p1077_p5)
}
  0x2c   : > { %923 = dma.hbm_to_vmem [thread:$0]  (!%p1337_p7), %s252_s14, 64, %s254_s13, %s242_s17  }
  0x2d   : > { %262 = sbr.rel (%p1283_p3) target bundleno = 1094 (0x446), region = 40  ;;  %s1354_s26 = sand.u32 (!%p1283_p3), 1, %s1190_s22  }
  0x2e   : > { %s856_s11 = sshll.u32 (!%p1283_p3), %s1354_s26, 2  ;;  %s265_s12 = scalar_lea.sflag (!%p1283_p3), [#allocation7], %s1354_s26 }
  0x2f   : > { %s268_s7 = scalar_lea.vmem (!%p1283_p3), [#allocation6], %s856_s11 }
  0x32   : > { %1169 = dma.done.wait (%p1316_p12), %s265_s12, 64  }
  0x33   : > { %1171 = vsyncadd (%p1316_p12), %s265_s12, 4294967232 }
  0x34   : > { %1173 = dma.done.wait (%p48_p1), [#allocation10], 512  }
  0x35   : > { %1175 = vsyncadd (%p48_p1), [#allocation10], 4294966784  ;;  %v895_v0 = vld [vmem:[#allocation9 + $0x8] sm:$0xff]  ;;  %v894_v1 = vld [vmem:[#allocation9] sm:$0xff]  ;;  %vm335_vm0 = vcmask 261120   ;;  %vm353_vm1 = vcmask 60416  }
  0x36   : > { %345 = vmatpush.bf16.msra.mxu0 %v895_v0  ;;  %v314_v2 = vld [vmem:[%s268_s7] sm:$0xf]  ;;  %v988_v3 = vld [vmem:[%s1491_s2] ss:$0 sm:$0xff]  ;;  %s1204_s25 = smov 72   ;;  %s1205_s13 = smov 120  }
  0x37   : > { %s1206_s14 = smov 88   ;;  %s1207_s15 = smov 104   ;;  %vm417_vm2 = vcmask 64512   ;;  %vm553_vm3 = vcmask 1043456   ;;  %vm634_vm4 = vcmask 126016   ;;  %vm641_vm5 = vcmask 191616  }
  0x38   : > { %s1208_s17 = smov 112   ;;  %s1209_s18 = smov 80   ;;  %vm648_vm6 = vcmask 257216  }
  0x39   : > { %s1210_s8 = smov 96   ;;  %s1211_s9 = smov 48  }
  0x3a   : > { %346 = vmatpush.bf16.msra.mxu0 %v894_v1  ;;  %s1212_s10 = smov 64   ;;  %s1213_s20 = smov 56  }
  0x3b   : > { %s1214_s11 = smov 40   ;;  %s860_s12 = sshll.u32 %s1354_s26, 5 }
  0x3c   : > { %s1415_s7 = scalar_lea.vmem [#allocation13], %s860_s12  ;;  %s1496_s1 = smov 8  }
  0x3d   : > { %869 = vmatmul.msk.bf16.vlgmr.msra.gmra.mxu0 %vm335_vm0, %v314_v2  ;;  %s1216_s29 = smov 16  }
  0xba   : > { %v348_v4 = vpop.f32.mrf.mxu0 }
  0xbb   : > { %v349_v5 = vadd.f32 %v988_v3, %v348_v4 }
  0xbd   : > { %v1370_v6 = vpack.c.bf16 %v349_v5, %v349_v5 }
  0xbf   : > { %399 = vrot.lane.b32.xlu2 %v1370_v6, %s1204_s25  ;;  %364 = vrot.lane.b32.xlu1 %v1370_v6, %s1205_s13  ;;  %354 = vst.msk [vmem:[#allocation2] sm:$0xf] %vm353_vm1, %v1370_v6  ;;  %s1217_s25 = smov 24   ;;  %s898_s13 = sshll.u32 %s1278_s28, 5 }
  0xc0   : > { %369 = vrot.lane.b32.xlu0 %v1370_v6, %s1206_s14 }
  0xc2   : > { %v350_v7 = vpop.f32.mrf.mxu0 }
  0xc6   : > { %v409_v26 = vld [vmem:[#allocation2] sm:$0xf] }
  0xc7   : > { %394 = vrot.lane.b32.xlu2 %v1370_v6, %s1207_s15  ;;  %379 = vrot.lane.b32.xlu1 %v1370_v6, %s1208_s17  ;;  %s719_s17 = scalar_lea.hbm %s1495_s6, %s898_s13 }
  0xc8   : > { %384 = vrot.lane.b32.xlu0 %v1370_v6, %s1209_s18  ;;  %s720_s18 = sshll.u32 %s1415_s7, 4  ;;  %s721_s18 = int_to_ptr.vmem [resolvable:$true] %s720_s18 }
  0xd0   : > { %356 = vrot.lane.b32.xlu0 %v1370_v6, %s1210_s8  ;;  %s722_s8 = sshll.u32 %s719_s17, 4  ;;  %s723_s8 = int_to_ptr.hbm [resolvable:$true] %s722_s8 }
 0x119   : > { %v400_v8 = vpop.permute.xlu2 %399 }
 0x11a   : > { %403 = vst.msk [vmem:[#allocation3 + $0xc] sm:$0xf] %vm353_vm1, %v400_v8 }
 0x121   : > { %v395_v9 = vpop.permute.xlu2 %394  ;;  %v416_v10 = vld [vmem:[#allocation3 + $0xc] sm:$0xf] }
 0x122   : > { %398 = vst.msk [vmem:[#allocation2 + $0xc] sm:$0xf] %vm353_vm1, %v395_v9  ;;  %v479_v11 = vsel %vm417_vm2, %v416_v10, 0 }
 0x123   : > { %488 = vmatpush.bf16.xpose.msrb.mxu0 %v479_v11 }
 0x129   : > { %v412_v12 = vld [vmem:[#allocation2 + $0xc] sm:$0xf] }
 0x12a   : > { %873 = vmatmul.msk.bf16.vlgmr.msrb.gmra.mxu0 %vm417_vm2, %v412_v12 }
 0x131   : > { %v365_v13 = vpop.permute.xlu1 %364 }
 0x132   : > { %368 = vst.msk [vmem:[#allocation2 + $0x4] sm:$0xf] %vm353_vm1, %v365_v13  ;;  %v370_v14 = vpop.permute.xlu0 %369 }
 0x133   : > { %373 = vst.msk [vmem:[#allocation3 + $0x4] sm:$0xf] %vm353_vm1, %v370_v14 }
 0x139   : > { %v380_v15 = vpop.permute.xlu1 %379  ;;  %v410_v20 = vld [vmem:[#allocation2 + $0x4] sm:$0xf] }
 0x13a   : > { %383 = vst.msk [vmem:[#allocation2 + $0x8] sm:$0xf] %vm353_vm1, %v380_v15  ;;  %v385_v16 = vpop.permute.xlu0 %384  ;;  %v414_v17 = vld [vmem:[#allocation3 + $0x4] sm:$0xf] }
 0x13b   : > { %388 = vst.msk [vmem:[#allocation3 + $0x8] sm:$0xf] %vm353_vm1, %v385_v16  ;;  %v441_v18 = vsel %vm417_vm2, %v414_v17, 0 }
 0x13c   : > { %450 = vmatpush.bf16.xpose.msra.mxu2 %v441_v18 }
 0x141   : > { %v411_v23 = vld [vmem:[#allocation2 + $0x8] sm:$0xf] }
 0x142   : > { %v357_v19 = vpop.permute.xlu0 %356  ;;  %v415_v21 = vld [vmem:[#allocation3 + $0x8] sm:$0xf] }
 0x143   : > { %359 = vst.msk [vmem:[#allocation3] sm:$0xf] %vm353_vm1, %v357_v19  ;;  %871 = vmatmul.msk.bf16.vlgmr.msra.gmra.mxu2 %vm417_vm2, %v410_v20  ;;  %v460_v22 = vsel %vm417_vm2, %v415_v21, 0 }
 0x144   : > { %469 = vmatpush.bf16.xpose.msra.mxu3 %v460_v22 }
 0x14a   : > { %v413_v24 = vld [vmem:[#allocation3] sm:$0xf] }
 0x14b   : > { %872 = vmatmul.msk.bf16.vlgmr.msra.gmra.mxu3 %vm417_vm2, %v411_v23  ;;  %v422_v25 = vsel %vm417_vm2, %v413_v24, 0 }
 0x14c   : > { %431 = vmatpush.bf16.xpose.msra.mxu1 %v422_v25 }
 0x153   : > { %870 = vmatmul.msk.bf16.vlgmr.msra.gmra.mxu1 %vm417_vm2, %v409_v26 }
 0x1a7   : > { %v490_v27 = vpop.f32.mrf.mxu0 }
 0x1a8   : > { %v503_v28 = vsel %vm417_vm2, %v490_v27, -inf }
 0x1a9   : > { %504 = vmax.xlane.f32.xlu0 %v503_v28 }
 0x1af   : > { %v492_v29 = vpop.f32.mrf.mxu0 }
 0x1bd   : > { %389 = vrot.lane.b32.xlu0 %v1370_v6, %s1211_s9  ;;  %s694_s9 = scalar_lea.sflag [#allocation14], %s1354_s26 }
 0x1c5   : > { %360 = vrot.lane.b32.xlu0 %v1370_v6, %s1212_s10  ;;  %s1110_s10 = sshra.s32 %s723_s8, 4  ;;  %s1111_s10 = int_to_ptr.hbm [resolvable:$true] %s1110_s10 }
 0x1c6   : > { %v452_v30 = vpop.f32.mrf.mxu2  ;;  %p1117_p12 = scmp.lt.s32.totalorder %s1111_s10, %s1495_s6 }
 0x1c7   : > { %v497_v31 = vsel %vm417_vm2, %v452_v30, -inf }
 0x1c8   : > { %498 = vmax.xlane.f32.xlu1 %v497_v31 }
 0x1ce   : > { %v454_v32 = vpop.f32.mrf.mxu2  ;;  %v471_v33 = vpop.f32.mrf.mxu3 }
 0x1cf   : > { %v500_v34 = vsel %vm417_vm2, %v471_v33, -inf }
 0x1d0   : > { %501 = vmax.xlane.f32.xlu2 %v500_v34  ;;  %v433_v35 = vpop.f32.mrf.mxu1 }
 0x1d1   : > { %v494_v37 = vsel %vm417_vm2, %v433_v35, -inf }
 0x1d6   : > { %v473_v36 = vpop.f32.mrf.mxu3 }
 0x1d7   : > { %v896_v36 = vld [vmem:[#allocation11] sm:$0xff] }
 0x1d8   : > { %495 = vmax.xlane.f32.xlu2 %v494_v37  ;;  %v435_v38 = vpop.f32.mrf.mxu1 }
 0x1e1   : > { %374 = vrot.lane.b32.xlu1 %v1370_v6, %s1213_s20  ;;  %s1112_s20 = scalar_lea.hbm %s1111_s10, 32 }
 0x1e2   : > { %p1113_p1 = scmp.ne.s32.totalorder %s1111_s10, %s1112_s20 }
 0x1e4   : > { %p1114_p3 = pnand %p1113_p1, %p1323_p4 }
 0x1e6   : > { %p1115_p5 = pneg %p1114_p3 }
 0x21c   : > { %v505_v39 = vpop.xlane.xlu0 %504 }
 0x21d   : > { %v509_v40 = vsub.f32 %v490_v27, %v505_v39 }
 0x21f   : > { %v516_v41 = vmul.f32 1.442695, %v509_v40 }
 0x221   : > { %990 = vpow2.f32 %v516_v41 }
 0x227   : > { %v991_v42 = vpop.eup %990 }
 0x228   : > { %v527_v43 = vsel %vm417_vm2, %v991_v42, 0.0 }
 0x229   : > { %528 = vadd.xlane.f32.xlu1 %v527_v43 }
 0x22f   : > { %v390_v44 = vpop.permute.xlu0 %389 }
 0x230   : > { %393 = vst.msk [vmem:[#allocation4 + $0x8] sm:$0xf] %vm353_vm1, %v390_v44 }
 0x237   : > { %v361_v45 = vpop.permute.xlu0 %360  ;;  %v548_v46 = vld [vmem:[#allocation4 + $0x8] sm:$0xf] }
 0x238   : > { %363 = vst.msk [vmem:[#allocation4] sm:$0xf] %vm353_vm1, %v361_v45  ;;  %v593_v47 = vsel %vm553_vm3, %v548_v46, 0 }
 0x239   : > { %602 = vmatpush.bf16.msrb.mxu3 %v593_v47 }
 0x23b   : > { %v499_v48 = vpop.xlane.xlu1 %498 }
 0x23c   : > { %v507_v49 = vsub.f32 %v452_v30, %v499_v48 }
 0x23e   : > { %v512_v50 = vmul.f32 1.442695, %v507_v49 }
 0x23f   : > { %v546_v51 = vld [vmem:[#allocation4] sm:$0xf] }
 0x240   : > { %992 = vpow2.f32 %v512_v50  ;;  %v555_v52 = vsel %vm553_vm3, %v546_v51, 0 }
 0x241   : > { %564 = vmatpush.bf16.msrb.mxu1 %v555_v52 }
 0x243   : > { %v502_v53 = vpop.xlane.xlu2 %501 }
 0x244   : > { %v508_v54 = vsub.f32 %v471_v33, %v502_v53 }
 0x246   : > { %v993_v55 = vpop.eup %992  ;;  %v514_v56 = vmul.f32 1.442695, %v508_v54 }
 0x247   : > { %v521_v57 = vsel %vm417_vm2, %v993_v55, 0.0 }
 0x248   : > { %994 = vpow2.f32 %v514_v56  ;;  %522 = vadd.xlane.f32.xlu2 %v521_v57 }
 0x24b   : > { %v496_v58 = vpop.xlane.xlu2 %495 }
 0x24c   : > { %v506_v59 = vsub.f32 %v433_v35, %v496_v58  ;;  %v897_v35 = vld [vmem:[#allocation11 + $0x8] sm:$0xff] }
 0x24d   : > { %680 = vmatpush.bf16.msra.mxu1 %v897_v35 }
 0x24e   : > { %v995_v60 = vpop.eup %994  ;;  %v510_v61 = vmul.f32 1.442695, %v506_v59 }
 0x24f   : > { %v524_v62 = vsel %vm417_vm2, %v995_v60, 0.0 }
 0x250   : > { %996 = vpow2.f32 %v510_v61  ;;  %525 = vadd.xlane.f32.xlu2 %v524_v62 }
 0x251   : > { %681 = vmatpush.bf16.msra.mxu1 %v896_v36 }
 0x253   : > { %v375_v63 = vpop.permute.xlu1 %374 }
 0x254   : > { %378 = vst.msk [vmem:[#allocation4 + $0x4] sm:$0xf] %vm353_vm1, %v375_v63 }
 0x256   : > { %v997_v0 = vpop.eup %996 }
 0x257   : > { %v518_v1 = vsel %vm417_vm2, %v997_v0, 0.0 }
 0x258   : > { %519 = vadd.xlane.f32.xlu0 %v518_v1 }
 0x25b   : > { %v547_v2 = vld [vmem:[#allocation4 + $0x4] sm:$0xf] }
 0x25c   : > { %v574_v3 = vsel %vm553_vm3, %v547_v2, 0 }
 0x25d   : > { %583 = vmatpush.bf16.msrb.mxu2 %v574_v3 }
 0x268   : > { %404 = vrot.lane.b32.xlu2 %v1370_v6, %s1214_s11 }
 0x29c   : > { %v529_v4 = vpop.xlane.xlu1 %528 }
 0x29d   : > { %998 = vrcp.f32 %v529_v4 }
 0x2a3   : > { %v999_v5 = vpop.eup %998 }
 0x2a4   : > { %v537_v7 = vmul.f32 %v999_v5, %v991_v42 }
 0x2a6   : > { %541 = vst.msk [vmem:[%s1415_s7 + $0x18] sm:$0xff] %vm417_vm2, %v537_v7  ;;  %v545_v22 = vpack.c.bf16 %v537_v7, %v537_v7 }
 0x2bb   : > { %v523_v8 = vpop.xlane.xlu2 %522 }
 0x2bc   : > { %1000 = vrcp.f32 %v523_v8 }
 0x2c2   : > { %v1001_v9 = vpop.eup %1000 }
 0x2c3   : > { %v535_v10 = vmul.f32 %v1001_v9, %v993_v55  ;;  %v526_v11 = vpop.xlane.xlu2 %525 }
 0x2c4   : > { %1002 = vrcp.f32 %v526_v11 }
 0x2c5   : > { %539 = vst.msk [vmem:[%s1415_s7 + $0x8] sm:$0xff] %vm417_vm2, %v535_v10  ;;  %v543_v6 = vpack.c.bf16 %v535_v10, %v535_v10 }
 0x2c7   : > { %875 = vmatmul.msk.bf16.vlgmr.msrb.gmra.mxu2 %vm417_vm2, %v543_v6 }
 0x2ca   : > { %v1003_v12 = vpop.eup %1002 }
 0x2cb   : > { %v536_v13 = vmul.f32 %v1003_v12, %v995_v60  ;;  %v520_v14 = vpop.xlane.xlu0 %519  ;;  %v405_v15 = vpop.permute.xlu2 %404 }
 0x2cc   : > { %1004 = vrcp.f32 %v520_v14  ;;  %408 = vst.msk [vmem:[#allocation4 + $0xc] sm:$0xf] %vm353_vm1, %v405_v15 }
 0x2cd   : > { %540 = vst.msk [vmem:[%s1415_s7 + $0x10] sm:$0xff] %vm417_vm2, %v536_v13  ;;  %v544_v16 = vpack.c.bf16 %v536_v13, %v536_v13 }
 0x2cf   : > { %876 = vmatmul.msk.bf16.vlgmr.msrb.gmra.mxu3 %vm417_vm2, %v544_v16 }
 0x2d2   : > { %v1005_v17 = vpop.eup %1004 }
 0x2d3   : > { %v534_v18 = vmul.f32 %v1005_v17, %v997_v0  ;;  %v549_v19 = vld [vmem:[#allocation4 + $0xc] sm:$0xf] }
 0x2d4   : > { %v612_v20 = vsel %vm553_vm3, %v549_v19, 0 }
 0x2d5   : > { %538 = vst.msk [vmem:[%s1415_s7] sm:$0xff] %vm417_vm2, %v534_v18  ;;  %621 = vmatpush.bf16.msra.mxu0 %v612_v20  ;;  %v542_v21 = vpack.c.bf16 %v534_v18, %v534_v18 }
 0x2d7   : > { %874 = vmatmul.msk.bf16.vlgmr.msrb.gmra.mxu1 %vm417_vm2, %v542_v21 }
 0x2d8   : > { %877 = vmatmul.msk.bf16.vlgmr.msra.gmra.mxu0 %vm417_vm2, %v545_v22 }
 0x34a   : > { %v585_v23 = vpop.f32.mrf.mxu2 }
 0x34b   : > { %v629_v24 = vpack.c.bf16 %v585_v23, %v585_v23 }
 0x34d   : > { %631 = vrot.lane.b32.xlu2 %v629_v24, %s1496_s1 }
 0x352   : > { %v587_v25 = vpop.f32.mrf.mxu2  ;;  %v604_v26 = vpop.f32.mrf.mxu3 }
 0x353   : > { %v636_v27 = vpack.c.bf16 %v604_v26, %v604_v26 }
 0x354   : > { %v566_v28 = vpop.f32.mrf.mxu1 }
 0x355   : > { %v627_v29 = vpack.c.bf16 %v566_v28, %v566_v28  ;;  %638 = vrot.lane.b32.xlu2 %v636_v27, %s1216_s29  ;;  %v623_v30 = vpop.f32.mrf.mxu0  ;;  %s1116_s29 = scalar_lea.hbm %s1495_s6, 64 }
 0x356   : > { %v643_v32 = vpack.c.bf16 %v623_v30, %v623_v30  ;;  %p1118_p7 = scmp.lt.s32.totalorder %s1116_s29, %s1112_s20 }
 0x357   : > { %628 = vst.msk [vmem:[#allocation5] sm:$0xf] %vm353_vm1, %v627_v29 }
 0x358   : > { %p1119_p8 = por %p1118_p7, %p1117_p12 }
 0x35a   : > { %v606_v31 = vpop.f32.mrf.mxu3  ;;  %p1120_p9 = pnand %p1119_p8, %p1115_p5 }
 0x35c   : > { %v568_v33 = vpop.f32.mrf.mxu1 }
 0x35d   : > { %645 = vrot.lane.b32.xlu2 %v643_v32, %s1217_s25  ;;  %v625_v34 = vpop.f32.mrf.mxu0 }
 0x3a7   : > { %v632_v37 = vpop.permute.xlu2 %631 }
 0x3a8   : > { %635 = vst.msk [vmem:[#allocation5] sm:$0xf] %vm634_vm4, %v632_v37 }
 0x3af   : > { %v639_v38 = vpop.permute.xlu2 %638 }
 0x3b0   : > { %642 = vst.msk [vmem:[#allocation5] sm:$0xf] %vm641_vm5, %v639_v38 }
 0x3b7   : > { %v646_v39 = vpop.permute.xlu2 %645 }
 0x3b8   : > { %649 = vst.msk [vmem:[#allocation5] sm:$0xf] %vm648_vm6, %v646_v39 }
 0x3bf   : > { %v650_v40 = vld [vmem:[#allocation5] sm:$0xf] }
 0x3c0   : > { %886 = vmatmul.msk.bf16.vlgmr.msra.gmra.mxu1 %vm335_vm0, %v650_v40 }
 0x3c1   : > { %1123 = shalt.err (!%p1120_p9)
}
 0x3c2   : > { %s1218_s7 = smov 128   ;;  %s1505_s13 = smov 8   ;;  %v989_v41 = vld [vmem:[%s1493_s4] ss:$0 sm:$0xff] }
 0x3c3   : > { %910 = dma.vmem_to_hbm [thread:$0]  (%p1323_p4), %s721_s18, 512, %s723_s8, %s694_s9, %s1218_s7, %s1218_s7, %s1505_s13  }
 0x3c4   : > { %s889_s14 = sshll.u32 %s1278_s28, 3  ;;  %s859_s15 = sshll.u32 %s1354_s26, 3 }
 0x3c5   : > { %s704_s1 = scalar_lea.hbm %s1494_s5, %s889_s14  ;;  %s305_s12 = scalar_lea.vmem [#allocation12], %s859_s15 }
 0x3c6   : > { %s706_s29 = sshll.u32 %s305_s12, 4  ;;  %s708_s25 = sshll.u32 %s704_s1, 4  ;;  %s707_s29 = int_to_ptr.vmem [resolvable:$true] %s706_s29  ;;  %s709_s25 = int_to_ptr.hbm [resolvable:$true] %s708_s25 }
 0x3c7   : > { %s689_s28 = scalar_lea.sflag [#allocation8], %s1354_s26  ;;  %s1138_s18 = sshra.s32 %s709_s25, 4  ;;  %s1139_s18 = int_to_ptr.hbm [resolvable:$true] %s1138_s18 }
 0x3c8   : > { %s1140_s8 = scalar_lea.hbm %s1139_s18, 8  ;;  %s1144_s13 = scalar_lea.hbm %s1494_s5, 16 }
 0x3c9   : > { %p1141_p10 = scmp.ne.s32.totalorder %s1139_s18, %s1140_s8  ;;  %p1145_p0 = scmp.lt.s32.totalorder %s1139_s18, %s1494_s5 }
 0x3ca   : > { %p1146_p2 = scmp.lt.s32.totalorder %s1144_s13, %s1140_s8 }
 0x3cb   : > { %p1142_p13 = pnand %p1141_p10, %p1323_p4 }
 0x3cc   : > { %p1147_p1 = por %p1146_p2, %p1145_p0 }
 0x3cd   : > { %p1143_p11 = pneg %p1142_p13 }
 0x3cf   : > { %p1148_p3 = pnand %p1147_p1, %p1143_p11 }
 0x43d   : > { %v683_v42 = vpop.f32.mrf.mxu1 }
 0x43e   : > { %v684_v43 = vadd.f32 %v989_v41, %v683_v42 }
 0x440   : > { %687 = vst.msk [vmem:[%s305_s12] sm:$0xff] %vm335_vm0, %v684_v43 }
 0x441   : > { %1151 = shalt.err (!%p1148_p3)
}
 0x442   : > { %909 = dma.vmem_to_hbm [thread:$0]  (%p1323_p4), %s707_s29, 128, %s709_s25, %s689_s28  }
 0x445   : > { %v685_v44 = vpop.f32.mrf.mxu1 }
 0x446 PF: > { %s737_s26 = sand.u32 1, %s1186_s21   ;;  %p1506_p5 = scmp.ge.s32.totalorder %s1198_s24, 2 }
 0x447   : > { %s738_s17 = scalar_lea.sflag [#allocation8], %s737_s26 }
 0x448   : > { %p925_p12 = pnand %p1506_p5, %p1327_p6 }
 0x44a   : > { %p926_p7 = pneg %p925_p12 }
 0x44c   : > { %1177 = dma.done.wait (%p926_p7), %s738_s17, 128  }
 0x44d   : > { %1179 = vsyncadd (%p926_p7), %s738_s17, 4294967168  ;;  %s748_s11 = scalar_lea.sflag [#allocation14], %s737_s26 }
 0x44e   : > { %1181 = dma.done.wait (%p926_p7), %s748_s11, 512  }
 0x44f   : > { %1183 = vsyncadd (%p926_p7), %s748_s11, 4294966784  ;;  %p24_p4 = scmp.ge.s32.totalorder %s1297_s16, 4   ;;  %s1507_s21 = smov %s1190_s22 }
 0x450   : > { %s1508_s22 = smov %s1194_s23  ;;  %s1509_s23 = smov %s1308_s19 }
 0x451   : > { %s1510_s24 = smov %s1297_s16  ;;  %26 = sbr.rel (!%p24_p4) target bundleno = 10 (0xa), region = 119 }
 0x456   :  { %754 = vsyncpa [#allocation7], 1 }
 0x457   :  { %756 = vsyncpa [#allocation7 + $0x1], 1 }
 0x458   :  { %757 = vsyncpa [#allocation10], 1 }
 0x459   :  { %758 = vsyncpa [#allocation8], 1 }
 0x45a   :  { %760 = vsyncpa [#allocation8 + $0x1], 1 }
 0x45b   :  { %761 = vsyncpa [#allocation14], 1 }
 0x45c   :  { %763 = vsyncpa [#allocation14 + $0x1], 1 }

</bundles_post_ra>
